<compile_context>
chip_gen: v6e
topology: v6e:2x2x1
jax: 0.10.0
libtpu: 0.0.40
codegen_flags: <defaults>
</compile_context>

<pallas_src>
import functools

import jax
import jax.numpy as jnp
from jax.experimental import pallas as pl
from jax.experimental.pallas import tpu as pltpu


EMB_SIZE = 128
HIDDEN = 256
LANE = 128
SUBLANE = 8  # activation / output refs are f32 -> (8, 128) min tile


def _round_up(x, m):
    return ((x + m - 1) // m) * m


def _inverse_dynamics_kernel(s_ref, ns_ref, w1a_ref, w1b_ref, b1_ref,
                             w2_ref, b2_ref, out_ref):
    # s_ref, ns_ref : (tb, emb)      f32 (cast to dot dtype in-kernel)
    # w1a_ref, w1b  : (emb, hidden)  dot dtype   (split halves of W1^T)
    # b1_ref        : (1, hidden)    f32
    # w2_ref        : (hidden, n_pad) dot dtype  (n_pad = num_actions -> 128)
    # b2_ref        : (1, n_pad)     f32
    # out_ref       : (tb, n_pad)    f32
    dt = w1a_ref.dtype
    h = jnp.dot(s_ref[...].astype(dt), w1a_ref[...],
                preferred_element_type=jnp.float32)
    h = h + jnp.dot(ns_ref[...].astype(dt), w1b_ref[...],
                    preferred_element_type=jnp.float32)
    h = jnp.maximum(h + b1_ref[...], 0.0)                  # bias + ReLU in f32
    out_ref[...] = (
        jnp.dot(h.astype(dt), w2_ref[...], preferred_element_type=jnp.float32)
        + b2_ref[...])


def prepare_params(w1, b1, w2, b2, *, dot_dtype=jnp.float32):
    """One-time (init-time) weight prep: transpose/split/pad/cast.

    w1: (hidden, 2*emb) torch layout, b1: (hidden,),
    w2: (num_actions, hidden),        b2: (num_actions,).
    """
    hidden, two_emb = w1.shape
    emb = two_emb // 2
    num_actions = w2.shape[0]
    n_pad = _round_up(num_actions, LANE)

    w1a = jnp.asarray(w1[:, :emb].T, dtype=dot_dtype)        # (emb, hidden)
    w1b = jnp.asarray(w1[:, emb:].T, dtype=dot_dtype)        # (emb, hidden)
    b1_2d = b1.reshape(1, hidden).astype(jnp.float32)
    w2t = jnp.pad(w2.astype(jnp.float32).T,
                  ((0, 0), (0, n_pad - num_actions))).astype(dot_dtype)
    b2_2d = jnp.pad(b2.astype(jnp.float32),
                    (0, n_pad - num_actions)).reshape(1, n_pad)
    return dict(w1a=w1a, w1b=w1b, b1=b1_2d, w2t=w2t, b2=b2_2d,
                num_actions=num_actions)


def _tile_batch(B, tb):
    """Pick the batch tile: large (amortize per-step overhead), sublane-
    aligned, and capped at ~ceil(B/2) so v7x's two TCs both get work."""
    if B <= SUBLANE:
        return B                                   # block == full dim is legal
    tb_r = max(SUBLANE, (tb // SUBLANE) * SUBLANE)
    half = _round_up(pl.cdiv(B, 2), SUBLANE)
    return max(SUBLANE, min(tb_r, half))


@functools.partial(jax.jit, static_argnames=("num_actions", "tb"))
def inverse_dynamics_forward(state_emb, next_state_emb,
                             w1a, w1b, b1_2d, w2t, b2_2d,
                             *, num_actions, tb=1024):
    """state_emb, next_state_emb: (B, emb) f32. Weights from prepare_params."""
    B, emb = state_emb.shape
    hidden = w1a.shape[1]
    n_pad = w2t.shape[1]

    tb_eff = _tile_batch(B, tb)
    grid = (pl.cdiv(B, tb_eff),)

    out = pl.pallas_call(
        _inverse_dynamics_kernel,
        out_shape=jax.ShapeDtypeStruct((B, n_pad), jnp.float32),
        grid_spec=pltpu.PrefetchScalarGridSpec(
            num_scalar_prefetch=0,
            grid=grid,
            in_specs=[
                pl.BlockSpec((tb_eff, emb), lambda i: (i, 0)),     # state
                pl.BlockSpec((tb_eff, emb), lambda i: (i, 0)),     # next_state
                pl.BlockSpec((emb, hidden), lambda i: (0, 0)),     # W1a^T
                pl.BlockSpec((emb, hidden), lambda i: (0, 0)),     # W1b^T
                pl.BlockSpec((1, hidden), lambda i: (0, 0)),       # b1
                pl.BlockSpec((hidden, n_pad), lambda i: (0, 0)),   # W2^T padded
                pl.BlockSpec((1, n_pad), lambda i: (0, 0)),        # b2 padded
            ],
            out_specs=pl.BlockSpec((tb_eff, n_pad), lambda i: (i, 0)),
        ),
        compiler_params=pltpu.CompilerParams(
            dimension_semantics=("parallel",)),
    )(state_emb, next_state_emb, w1a, w1b, b1_2d, w2t, b2_2d)

    return out[:, :num_actions]


def _orthogonal(key, shape, gain=1.0, dtype=jnp.float32):
    """Deterministic orthogonal init matching torch.nn.init.orthogonal_."""
    rows, cols = shape
    n = max(rows, cols)
    a = jax.random.normal(key, (n, min(rows, cols)), dtype=jnp.float32)
    q, r = jnp.linalg.qr(a)
    q = q * jnp.sign(jnp.diagonal(r))[None, :]
    if rows < cols:
        q = q.T
    return (gain * q[:rows, :cols]).astype(dtype)


def reference_forward(state_emb, next_state_emb, w1, b1, w2, b2):
    x = jnp.concatenate([state_emb, next_state_emb], axis=-1)
    h = jnp.maximum(x @ w1.T + b1, 0.0)
    return h @ w2.T + b2


if __name__ == "__main__":
    num_actions = 8
    batch = 16

    key = jax.random.PRNGKey(0)
    k_s, k_ns, k_w1, k_w2 = jax.random.split(key, 4)

    state_emb = jax.random.normal(k_s, (batch, EMB_SIZE), dtype=jnp.float32)
    next_state_emb = jax.random.normal(k_ns, (batch, EMB_SIZE), dtype=jnp.float32)

    relu_gain = 2.0 ** 0.5  # nn.init.calculate_gain('relu')
    w1 = _orthogonal(k_w1, (HIDDEN, 2 * EMB_SIZE), gain=relu_gain)  # (out, in)
    b1 = jnp.zeros((HIDDEN,), dtype=jnp.float32)
    w2 = _orthogonal(k_w2, (num_actions, HIDDEN), gain=1.0)
    b2 = jnp.zeros((num_actions,), dtype=jnp.float32)

    params = prepare_params(w1, b1, w2, b2, dot_dtype=jnp.float32)

    logits = inverse_dynamics_forward(
        state_emb, next_state_emb,
        params["w1a"], params["w1b"], params["b1"],
        params["w2t"], params["b2"],
        num_actions=params["num_actions"])
    logits = jax.block_until_ready(logits)
    assert logits.shape == (batch, num_actions)

    ref = reference_forward(state_emb, next_state_emb, w1, b1, w2, b2)
    assert jnp.allclose(logits, ref, atol=2e-2, rtol=2e-2), \
        "mismatch vs f32 reference"
    assert bool(jnp.all(jnp.isfinite(logits))), "non-finite logits"

    print("KERNEL_OK")
</pallas_src>

<mosaic_0001>
module attributes {stable_mosaic.version = 11 : i64} {
  func.func @_inverse_dynamics_kernel(%arg0: i32, %arg1: memref<8x128xf32, #tpu.memory_space<vmem>>, %arg2: memref<8x128xf32, #tpu.memory_space<vmem>>, %arg3: memref<128x256xf32, #tpu.memory_space<vmem>>, %arg4: memref<128x256xf32, #tpu.memory_space<vmem>>, %arg5: memref<1x256xf32, #tpu.memory_space<vmem>>, %arg6: memref<256x128xf32, #tpu.memory_space<vmem>>, %arg7: memref<1x128xf32, #tpu.memory_space<vmem>>, %arg8: memref<8x128xf32, #tpu.memory_space<vmem>>) attributes {dimension_semantics = [#tpu.dimension_semantics<parallel>], iteration_bounds = array<i64: 2>, scalar_prefetch = 0 : i64, scratch_operands = 0 : i64, tpu.core_type = #tpu.core_type<tc>, window_params = [{transform_indices = @transform_0, window_bounds = array<i64: 8, 128>}, {transform_indices = @transform_1, window_bounds = array<i64: 8, 128>}, {pipeline_mode = #tpu.pipeline_mode<synchronous>, transform_indices = @transform_2, window_bounds = array<i64: 128, 256>}, {pipeline_mode = #tpu.pipeline_mode<synchronous>, transform_indices = @transform_3, window_bounds = array<i64: 128, 256>}, {pipeline_mode = #tpu.pipeline_mode<synchronous>, transform_indices = @transform_4, window_bounds = array<i64: 1, 256>}, {pipeline_mode = #tpu.pipeline_mode<synchronous>, transform_indices = @transform_5, window_bounds = array<i64: 256, 128>}, {pipeline_mode = #tpu.pipeline_mode<synchronous>, transform_indices = @transform_6, window_bounds = array<i64: 1, 128>}, {transform_indices = @transform_7, window_bounds = array<i64: 8, 128>}]} {
    %c0 = arith.constant 0 : index
    %c0_0 = arith.constant 0 : index
    %0 = vector.load %arg1[%c0, %c0_0] : memref<8x128xf32, #tpu.memory_space<vmem>>, vector<8x128xf32>
    %c0_1 = arith.constant 0 : index
    %c0_2 = arith.constant 0 : index
    %1 = vector.load %arg3[%c0_1, %c0_2] : memref<128x256xf32, #tpu.memory_space<vmem>>, vector<128x256xf32>
    %cst = arith.constant dense<0.000000e+00> : vector<8x256xf32>
    %2 = tpu.matmul %0, %1, %cst {dimension_numbers = #tpu.dot_dimension_numbers<[1], [0], [0], [1], [0, 0, 1, 1], [], []>} : vector<8x128xf32>, vector<128x256xf32>, vector<8x256xf32> -> vector<8x256xf32>
    %c0_3 = arith.constant 0 : index
    %c0_4 = arith.constant 0 : index
    %3 = vector.load %arg2[%c0_3, %c0_4] : memref<8x128xf32, #tpu.memory_space<vmem>>, vector<8x128xf32>
    %c0_5 = arith.constant 0 : index
    %c0_6 = arith.constant 0 : index
    %4 = vector.load %arg4[%c0_5, %c0_6] : memref<128x256xf32, #tpu.memory_space<vmem>>, vector<128x256xf32>
    %cst_7 = arith.constant dense<0.000000e+00> : vector<8x256xf32>
    %5 = tpu.matmul %3, %4, %cst_7 {dimension_numbers = #tpu.dot_dimension_numbers<[1], [0], [0], [1], [0, 0, 1, 1], [], []>} : vector<8x128xf32>, vector<128x256xf32>, vector<8x256xf32> -> vector<8x256xf32>
    %6 = arith.addf %2, %5 : vector<8x256xf32>
    %c0_8 = arith.constant 0 : index
    %c0_9 = arith.constant 0 : index
    %7 = vector.load %arg5[%c0_8, %c0_9] : memref<1x256xf32, #tpu.memory_space<vmem>>, vector<1x256xf32>
    %8 = vector.broadcast %7 : vector<1x256xf32> to vector<8x256xf32>
    %9 = arith.addf %6, %8 : vector<8x256xf32>
    %cst_10 = arith.constant 0.000000e+00 : f32
    %10 = vector.broadcast %cst_10 : f32 to vector<8x256xf32>
    %11 = arith.maximumf %9, %10 : vector<8x256xf32>
    %c0_11 = arith.constant 0 : index
    %c0_12 = arith.constant 0 : index
    %12 = vector.load %arg6[%c0_11, %c0_12] : memref<256x128xf32, #tpu.memory_space<vmem>>, vector<256x128xf32>
    %cst_13 = arith.constant dense<0.000000e+00> : vector<8x128xf32>
    %13 = tpu.matmul %11, %12, %cst_13 {dimension_numbers = #tpu.dot_dimension_numbers<[1], [0], [0], [1], [0, 0, 1, 1], [], []>} : vector<8x256xf32>, vector<256x128xf32>, vector<8x128xf32> -> vector<8x128xf32>
    %c0_14 = arith.constant 0 : index
    %c0_15 = arith.constant 0 : index
    %14 = vector.load %arg7[%c0_14, %c0_15] : memref<1x128xf32, #tpu.memory_space<vmem>>, vector<1x128xf32>
    %15 = vector.broadcast %14 : vector<1x128xf32> to vector<8x128xf32>
    %16 = arith.addf %13, %15 : vector<8x128xf32>
    %c0_16 = arith.constant 0 : index
    %c0_17 = arith.constant 0 : index
    %17 = vector.load %arg8[%c0_16, %c0_17] : memref<8x128xf32, #tpu.memory_space<vmem>>, vector<8x128xf32>
    tpu.vector_store %arg8[%c0_16, %c0_17], %16 {strides = array<i32>} : memref<8x128xf32, #tpu.memory_space<vmem>>, vector<8x128xf32>,
    return
  }
  func.func @transform_0(%arg0: i32) -> (i32, i32) {
    %c0_i32 = arith.constant 0 : i32
    %c0_i32_0 = arith.constant 0 : i32
    return %arg0, %c0_i32 : i32, i32
  }
  func.func @transform_1(%arg0: i32) -> (i32, i32) {
    %c0_i32 = arith.constant 0 : i32
    %c0_i32_0 = arith.constant 0 : i32
    return %arg0, %c0_i32 : i32, i32
  }
  func.func @transform_2(%arg0: i32) -> (i32, i32) {
    %c0_i32 = arith.constant 0 : i32
    %c0_i32_0 = arith.constant 0 : i32
    %c0_i32_1 = arith.constant 0 : i32
    return %c0_i32, %c0_i32_0 : i32, i32
  }
  func.func @transform_3(%arg0: i32) -> (i32, i32) {
    %c0_i32 = arith.constant 0 : i32
    %c0_i32_0 = arith.constant 0 : i32
    %c0_i32_1 = arith.constant 0 : i32
    return %c0_i32, %c0_i32_0 : i32, i32
  }
  func.func @transform_4(%arg0: i32) -> (i32, i32) {
    %c0_i32 = arith.constant 0 : i32
    %c0_i32_0 = arith.constant 0 : i32
    %c0_i32_1 = arith.constant 0 : i32
    return %c0_i32, %c0_i32_0 : i32, i32
  }
  func.func @transform_5(%arg0: i32) -> (i32, i32) {
    %c0_i32 = arith.constant 0 : i32
    %c0_i32_0 = arith.constant 0 : i32
    %c0_i32_1 = arith.constant 0 : i32
    return %c0_i32, %c0_i32_0 : i32, i32
  }
  func.func @transform_6(%arg0: i32) -> (i32, i32) {
    %c0_i32 = arith.constant 0 : i32
    %c0_i32_0 = arith.constant 0 : i32
    %c0_i32_1 = arith.constant 0 : i32
    return %c0_i32, %c0_i32_0 : i32, i32
  }
  func.func @transform_7(%arg0: i32) -> (i32, i32) {
    %c0_i32 = arith.constant 0 : i32
    %c0_i32_0 = arith.constant 0 : i32
    return %arg0, %c0_i32 : i32, i32
  }
}

</mosaic_0001>

<bundles_post_ra>
// kernel: inverse_dynamics_forward.1
= control target key start
LH: loop header
LB: loop body
LE: loop exit
PB: predicated region body
PF: predicated region fallthrough
CT: control target
= control target key end

     0   :  { %s1392_s0 = inlined_call_operand.hbm [shape: f32[16,128], index: 0, kind: input, shape index: {}]   ;;  %s1393_s1 = inlined_call_operand.hbm [shape: f32[16,128], index: 1, kind: input, shape index: {}]   ;;  %s1394_s2 = inlined_call_operand.hbm [shape: f32[128,256], index: 2, kind: input, shape index: {}]   ;;  %s1395_s3 = inlined_call_operand.hbm [shape: f32[128,256], index: 3, kind: input, shape index: {}]   ;;  %s1396_s4 = inlined_call_operand.vmem [shape: f32[1,256], index: 4, kind: input, shape index: {}]   ;;  %s1397_s5 = inlined_call_operand.hbm [shape: f32[256,128], index: 5, kind: input, shape index: {}]   ;;  %s1398_s6 = inlined_call_operand.vmem [shape: f32[1,128], index: 6, kind: input, shape index: {}]   ;;  %s1399_s7 = inlined_call_operand.vmem [shape: f32[16,128], index: 7, kind: output, shape index: {}]  }
   0x1   :  { %1403 = sst [smem:[#allocation14_spill]] %s1394_s2 }
   0x2   :  { %12 = vsyncpa [#allocation3], 0 }
   0x3   :  { %14 = vsyncpa [#allocation3 + $0x1], 0 }
   0x4   :  { %15 = vsyncpa [#allocation5], 0 }
   0x5   :  { %17 = vsyncpa [#allocation5 + $0x1], 0 }
   0x6   :  { %18 = vsyncpa [#allocation8], 0  ;;  %s1191_s24 = smov 0   ;;  %s1193_s25 = smov 0  }
   0x7   :  { %s1195_s26 = smov 0   ;;  %s1197_s27 = smov 0  }
   0x8 LB: > { %s1210_s28 = sadd.s32 4294967295, %s1139_s27   ;;  %p44_p0 = scmp.ne.s32.totalorder %s1131_s25, %s1127_s24  ;;  %s1139_s27 = sphi %s1197_s27, %s1418_s27   ;;  %s1135_s26 = sphi %s1195_s26, %s1417_s26   ;;  %s1131_s25 = sphi %s1193_s25, %s1416_s25   ;;  %s1127_s24 = sphi %s1191_s24, %s1415_s24  }
   0x9   : > { %p1400_p1 = scmp.eq.s32.totalorder %s1210_s28, 0  ;;  %p825_p2 = scmp.ge.s32.totalorder %s1139_s27, 1 }
   0xa   : > { %p212_p3 = scmp.lt.s32.totalorder %s1139_s27, 3  ;;  %s1141_s8 = smov [#allocation6]  }
   0xb   : > { %p1218_p4 = por %p1400_p1, %p44_p0  ;;  %s224_s9 = sshll.u32 %s1141_s8, 4  ;;  %s225_s9 = int_to_ptr.vmem [resolvable:$true] %s224_s9 }
   0xc   : > { %p1222_p5 = pnand %p825_p2, %p212_p3  ;;  %s1142_s11 = smov [#allocation7]  }
   0xd   : > { %s1404_s29 = scalar_select %p1218_p4, 1, 0 }
   0xe   : > { %s1405_s30 = scalar_select %p1222_p5, 1, 0 }
   0xf   : > { %p895_p6 = pneg %p1222_p5  ;;  %s237_s12 = sshll.u32 %s1142_s11, 4  ;;  %s238_s12 = int_to_ptr.vmem [resolvable:$true] %s237_s12 }
  0x10   : > { %s1143_s13 = smov [#allocation9]   ;;  %s970_s15 = scalar_lea.vmem %s225_s9, 4096 }
  0x11   : > { %p1230_p7 = pnand %p895_p6, %p1400_p1  ;;  %s253_s14 = sshll.u32 %s1143_s13, 4  ;;  %s254_s14 = int_to_ptr.vmem [resolvable:$true] %s253_s14 }
  0x12   : > { %p971_p9 = scmp.ne.s32.totalorder %s225_s9, %s970_s15  ;;  %p978_p12 = scmp.lt.s32.totalorder %s225_s9, %s225_s9 }
  0x13   : > { %p961_p8 = pneg %p1230_p7  ;;  %p979_p13 = scmp.lt.s32.totalorder %s970_s15, %s970_s15 }
  0x15   : > { %p973_p10 = pnand %p971_p9, %p961_p8  ;;  %p980_p0 = por %p979_p13, %p978_p12 }
  0x17   : > { %p974_p11 = pneg %p973_p10 }
  0x19   : > { %p981_p2 = pnand %p980_p0, %p974_p11 }
  0x1b   : > { %984 = shalt.err (!%p981_p2)
}
  0x1c   : > { %s1144_s16 = smov 256   ;;  %s1145_s17 = smov 16  }
  0x1d   : > { %s1407_s2 = sld [smem:[#allocation14_spill]]  ;;  %s996_s20 = scalar_lea.vmem %s238_s12, 4096 }
  0x1e   : > { %p997_p3 = scmp.ne.s32.totalorder %s238_s12, %s996_s20  ;;  %p1004_p10 = scmp.lt.s32.totalorder %s238_s12, %s238_s12 }
  0x1f   : > { %p1005_p1 = scmp.lt.s32.totalorder %s996_s20, %s996_s20 }
  0x20   : > { %p999_p6 = pnand %p997_p3, %p961_p8 }
  0x21   : > { %p1006_p12 = por %p1005_p1, %p1004_p10 }
  0x22   : > { %p1000_p9 = pneg %p999_p6 }
  0x23   : > { %898 = dma.hbm_to_vmem [thread:$0]  (!%p1230_p7), %s1407_s2, 4096, %s225_s9, [#allocation5], %s1144_s16, %s1144_s16, %s1145_s17  }
  0x24   : > { %p1007_p11 = pnand %p1006_p12, %p1000_p9 }
  0x26   : > { %1010 = shalt.err (!%p1007_p11)
}
  0x27   : > { %901 = dma.hbm_to_vmem [thread:$0]  (!%p1230_p7), %s1395_s3, 4096, %s238_s12, [#allocation8], %s1144_s16, %s1144_s16, %s1145_s17  }
  0x28   : > { %s1022_s23 = scalar_lea.vmem %s254_s14, 4096  ;;  %p1030_p3 = scmp.lt.s32.totalorder %s254_s14, %s254_s14 }
  0x29   : > { %p1023_p13 = scmp.ne.s32.totalorder %s254_s14, %s1022_s23  ;;  %p1031_p6 = scmp.lt.s32.totalorder %s1022_s23, %s1022_s23 }
  0x2b   : > { %p1025_p0 = pnand %p1023_p13, %p961_p8  ;;  %p1032_p4 = por %p1031_p6, %p1030_p3 }
  0x2d   : > { %p1026_p2 = pneg %p1025_p0 }
  0x2f   : > { %p1033_p1 = pnand %p1032_p4, %p1026_p2 }
  0x31   : > { %1036 = shalt.err (!%p1033_p1)
}
  0x32   : > { %s1146_s24 = smov 128   ;;  %s1147_s8 = smov 8  }
  0x33   : > { %904 = dma.hbm_to_vmem [thread:$0]  (!%p1230_p7), %s1397_s5, 4096, %s254_s14, [#allocation8], %s1146_s24, %s1146_s24, %s1147_s8  }
  0x34   : > { %s1261_s12 = sadd.s32 1, %s1139_s27   ;;  %s31_s15 = sadd.s32 1, %s1135_s26 }
  0x35   : > { %s28_s13 = ssub.s32 %s1139_s27, %s1261_s12  ;;  %p38_p8 = scmp.ne.s32.totalorder %s1135_s26, %s1131_s25 }
  0x36   : > { %p29_p4 = scmp.eq.s32.totalorder %s28_s13, 0  ;;  %p39_p9 = scmp.eq.s32.totalorder %s1139_s27, 0 }
  0x37   : > { %p915_p10 = scmp.lt.s32.totalorder %s1139_s27, 2  ;;  %s270_s17 = sand.u32 1, %s1135_s26  }
  0x38   : > { %s1271_s16 = scalar_select %p29_p4, %s1135_s26, %s31_s15  }
  0x39   : > { %p40_p12 = por %p39_p9, %p38_p8  ;;  %s1274_s18 = sshll.u32 %s270_s17, 3 }
  0x3a   : > { %s831_s10 = sshll.u32 %s1139_s27, 7  ;;  %s274_s21 = scalar_lea.vmem [#allocation2], %s1274_s18 }
  0x3b   : > { %s1280_s20 = scalar_lea.hbm %s1392_s0, %s831_s10  ;;  %s281_s22 = sshll.u32 %s274_s21, 4  ;;  %s1283_s22 = int_to_ptr.vmem [resolvable:$true] %s281_s22 }
  0x3c   : > { %p1285_p7 = pnand %p915_p10, %p40_p12  ;;  %s1292_s9 = scalar_lea.hbm %s1393_s1, %s831_s10 }
  0x3d   : > { %s288_s11 = sand.u32 1, %s1139_s27   ;;  %s271_s13 = scalar_lea.sflag [#allocation3], %s270_s17 }
  0x3e   : > { %s1037_s15 = scalar_lea.hbm %s1280_s20, 128  ;;  %p1039_p13 = pneg %p1285_p7 }
  0x3f   : > { %p1038_p11 = scmp.ne.s32.totalorder %s1280_s20, %s1037_s15  ;;  %s1042_s21 = scalar_lea.hbm %s1392_s0, 256 }
  0x40   : > { %p1043_p3 = scmp.lt.s32.totalorder %s1280_s20, %s1392_s0  ;;  %p1044_p6 = scmp.lt.s32.totalorder %s1042_s21, %s1037_s15 }
  0x41   : > { %p1040_p0 = pnand %p1039_p13, %p1038_p11 }
  0x42   : > { %p1045_p1 = por %p1044_p6, %p1043_p3 }
  0x43   : > { %p1041_p2 = pneg %p1040_p0 }
  0x45   : > { %p1046_p4 = pnand %p1045_p1, %p1041_p2 }
  0x47   : > { %1049 = shalt.err (!%p1046_p4)
}
  0x48   : > { %s1050_s17 = scalar_lea.vmem %s1283_s22, 128  ;;  %s1148_s10 = smov [#allocation2]  }
  0x49   : > { %p1051_p8 = scmp.ne.s32.totalorder %s1283_s22, %s1050_s17  ;;  %s1055_s8 = sshll.u32 %s1148_s10, 4  ;;  %s1056_s8 = int_to_ptr.vmem [resolvable:$false] %s1055_s8 }
  0x4a   : > { %s1057_s19 = scalar_lea.vmem %s1056_s8, 256  ;;  %p1058_p12 = scmp.lt.s32.totalorder %s1283_s22, %s1056_s8 }
  0x4b   : > { %p1053_p9 = pnand %p1051_p8, %p1039_p13  ;;  %p1059_p11 = scmp.lt.s32.totalorder %s1057_s19, %s1050_s17 }
  0x4d   : > { %p1054_p10 = pneg %p1053_p9  ;;  %p1060_p0 = por %p1059_p11, %p1058_p12 }
  0x4f   : > { %p1061_p3 = pnand %p1060_p0, %p1054_p10 }
  0x51   : > { %1064 = shalt.err (!%p1061_p3)
}
  0x52   : > { %908 = dma.hbm_to_vmem [thread:$0]  (!%p1285_p7), %s1280_s20, 128, %s1283_s22, %s271_s13  }
  0x53   : > { %s292_s2 = scalar_lea.vmem [#allocation4], %s1274_s18  ;;  %s289_s14 = scalar_lea.sflag [#allocation5], %s288_s11 }
  0x54   : > { %s299_s15 = sshll.u32 %s292_s2, 4  ;;  %s1065_s21 = scalar_lea.hbm %s1292_s9, 128  ;;  %s300_s15 = int_to_ptr.vmem [resolvable:$true] %s299_s15 }
  0x55   : > { %p1066_p2 = scmp.ne.s32.totalorder %s1292_s9, %s1065_s21  ;;  %s1070_s10 = scalar_lea.hbm %s1393_s1, 256 }
  0x56   : > { %p1071_p4 = scmp.lt.s32.totalorder %s1292_s9, %s1393_s1  ;;  %p1072_p8 = scmp.lt.s32.totalorder %s1070_s10, %s1065_s21 }
  0x57   : > { %p1068_p6 = pnand %p1066_p2, %p1039_p13 }
  0x58   : > { %p1073_p9 = por %p1072_p8, %p1071_p4 }
  0x59   : > { %p1069_p1 = pneg %p1068_p6 }
  0x5b   : > { %p1074_p10 = pnand %p1073_p9, %p1069_p1 }
  0x5d   : > { %1077 = shalt.err (!%p1074_p10)
}
  0x5e   : > { %s1078_s27 = scalar_lea.vmem %s300_s15, 128  ;;  %s1149_s18 = smov [#allocation4]  }
  0x5f   : > { %p1079_p12 = scmp.ne.s32.totalorder %s300_s15, %s1078_s27  ;;  %s1083_s20 = sshll.u32 %s1149_s18, 4  ;;  %s1084_s20 = int_to_ptr.vmem [resolvable:$false] %s1083_s20 }
  0x60   : > { %s1085_s22 = scalar_lea.vmem %s1084_s20, 256  ;;  %p1086_p3 = scmp.lt.s32.totalorder %s300_s15, %s1084_s20 }
  0x61   : > { %p1081_p11 = pnand %p1079_p12, %p1039_p13  ;;  %p1087_p2 = scmp.lt.s32.totalorder %s1085_s22, %s1078_s27 }
  0x63   : > { %p1082_p0 = pneg %p1081_p11  ;;  %p1088_p6 = por %p1087_p2, %p1086_p3 }
  0x65   : > { %p1089_p5 = pnand %p1088_p6, %p1082_p0 }
  0x67   : > { %1092 = shalt.err (!%p1089_p5)
}
  0x68   : > { %911 = dma.hbm_to_vmem [thread:$0]  (!%p1285_p7), %s1292_s9, 128, %s300_s15, %s289_s14  }
  0x69   : > { %p1409_p1 = scmp.ne.s32.totalorder %s1405_s30, 0 }
  0x6a   : > { %s310_s11 = sand.u32 (!%p1409_p1), 1, %s1131_s25   ;;  %p1410_p13 = scmp.ne.s32.totalorder (!%p1409_p1), %s1404_s29, 0 }
  0x6b   : > { %308 = sbr.rel (%p1409_p1) target bundleno = 558 (0x22e), region = 48  ;;  %s1343_s13 = sshll.u32 (!%p1409_p1), %s310_s11, 3 }
  0x6c   : > { %s311_s2 = scalar_lea.sflag (!%p1409_p1), [#allocation3], %s310_s11  ;;  %s314_s21 = scalar_lea.vmem (!%p1409_p1), [#allocation2], %s1343_s13 }
  0x70   : > { %1110 = dma.done.wait (%p1410_p13), %s311_s2, 128  }
  0x71   : > { %1112 = vsyncadd (%p1410_p13), %s311_s2, 4294967168  ;;  %s319_s23 = sand.u32 1, %s1210_s28   ;;  %s323_s30 = scalar_lea.vmem [#allocation4], %s1343_s13 }
  0x72   : > { %s320_s9 = scalar_lea.sflag [#allocation5], %s319_s23 }
  0x73   : > { %1114 = dma.done.wait (%p1410_p13), %s320_s9, 128  }
  0x74   : > { %1116 = vsyncadd (%p1410_p13), %s320_s9, 4294967168  ;;  %p1411_p5 = scmp.eq.s32.totalorder %s1210_s28, 0 }
  0x76   : > { %1118 = dma.done.wait (%p1411_p5), [#allocation5], 4096   ;;  %p1412_p7 = pmov %p1411_p5 }
  0x77   : > { %p1413_p4 = pmov %p1411_p5 }
  0x78   : > { %1120 = vsyncadd (%p1412_p7), [#allocation5], 4294963200 }
  0x79   : > { %1122 = dma.done.wait (%p1413_p4), [#allocation8], 8192   ;;  %p1414_p8 = pmov %p1413_p4 }
  0x7a   : > { %v1150_v0 = vmov 0.0   ;;  %v439_v1 = vld [vmem:[#allocation7 + $0xf8] sm:$0xff]  ;;  %v438_v3 = vld [vmem:[#allocation7 + $0xf0] sm:$0xff]  ;;  %v437_v5 = vld [vmem:[#allocation7 + $0xe8] sm:$0xff]  ;;  %p370_p9 = scmp.lt.s32.totalorder %s1210_s28, 1 }
  0x7b   : > { %1124 = vsyncadd (%p1414_p8), [#allocation8], 4294959104  ;;  %504 = vmatprep.mubr.f32.mxu0 %v1150_v0  ;;  %575 = vmatprep.mubr.f32.mxu1 %v1150_v0  ;;  %v406_v2 = vld [vmem:[#allocation6 + $0xf8] sm:$0xff]  ;;  %v405_v4 = vld [vmem:[#allocation6 + $0xf0] sm:$0xff] }
  0x7c   : > { %440 = vmatprep.subr.mxu0 %v439_v1  ;;  %511 = vmatprep.subr.mxu1 %v406_v2  ;;  %v404_v6 = vld [vmem:[#allocation6 + $0xe8] sm:$0xff]  ;;  %v436_v7 = vld [vmem:[#allocation7 + $0xe0] sm:$0xff]  ;;  %v435_v9 = vld [vmem:[#allocation7 + $0xd8] sm:$0xff]  ;;  %s1420_s28 = smov (!%p370_p9, %s1210_s28), 1 }
  0x7d   : > { %441 = vmatpush1.msra.mxu0 %v438_v3  ;;  %512 = vmatpush1.msra.mxu1 %v405_v4  ;;  %v403_v8 = vld [vmem:[#allocation6 + $0xe0] sm:$0xff]  ;;  %v402_v10 = vld [vmem:[#allocation6 + $0xd8] sm:$0xff]  ;;  %v434_v11 = vld [vmem:[#allocation7 + $0xd0] sm:$0xff]  ;;  %s840_s14 = sshll.u32 %s1420_s28, 3 }
  0x7e   : > { %442 = vmatprep.subr.mxu0 %v437_v5  ;;  %513 = vmatprep.subr.mxu1 %v404_v6  ;;  %v401_v12 = vld [vmem:[#allocation6 + $0xd0] sm:$0xff]  ;;  %v433_v13 = vld [vmem:[#allocation7 + $0xc8] sm:$0xff]  ;;  %v432_v15 = vld [vmem:[#allocation7 + $0xc0] sm:$0xff]  ;;  %s373_s19 = scalar_lea.vmem %s1399_s7, %s840_s14 }
  0x7f   : > { %443 = vmatpush1.msra.mxu0 %v436_v7  ;;  %514 = vmatpush1.msra.mxu1 %v403_v8  ;;  %v400_v14 = vld [vmem:[#allocation6 + $0xc8] sm:$0xff]  ;;  %v399_v16 = vld [vmem:[#allocation6 + $0xc0] sm:$0xff]  ;;  %v431_v17 = vld [vmem:[#allocation7 + $0xb8] sm:$0xff] }
  0x80   : > { %444 = vmatprep.subr.mxu0 %v435_v9  ;;  %515 = vmatprep.subr.mxu1 %v402_v10  ;;  %v398_v18 = vld [vmem:[#allocation6 + $0xb8] sm:$0xff]  ;;  %v430_v19 = vld [vmem:[#allocation7 + $0xb0] sm:$0xff]  ;;  %v429_v21 = vld [vmem:[#allocation7 + $0xa8] sm:$0xff] }
  0x81   : > { %445 = vmatpush1.msra.mxu0 %v434_v11  ;;  %516 = vmatpush1.msra.mxu1 %v401_v12  ;;  %v397_v20 = vld [vmem:[#allocation6 + $0xb0] sm:$0xff]  ;;  %v396_v22 = vld [vmem:[#allocation6 + $0xa8] sm:$0xff]  ;;  %v428_v23 = vld [vmem:[#allocation7 + $0xa0] sm:$0xff] }
  0x82   : > { %446 = vmatprep.subr.mxu0 %v433_v13  ;;  %517 = vmatprep.subr.mxu1 %v400_v14  ;;  %v395_v24 = vld [vmem:[#allocation6 + $0xa0] sm:$0xff]  ;;  %v427_v25 = vld [vmem:[#allocation7 + $0x98] sm:$0xff]  ;;  %v426_v27 = vld [vmem:[#allocation7 + $0x90] sm:$0xff] }
  0x83   : > { %447 = vmatpush1.msra.mxu0 %v432_v15  ;;  %518 = vmatpush1.msra.mxu1 %v399_v16  ;;  %v394_v26 = vld [vmem:[#allocation6 + $0x98] sm:$0xff]  ;;  %v393_v28 = vld [vmem:[#allocation6 + $0x90] sm:$0xff]  ;;  %v425_v29 = vld [vmem:[#allocation7 + $0x88] sm:$0xff] }
  0x84   : > { %448 = vmatprep.subr.mxu0 %v431_v17  ;;  %519 = vmatprep.subr.mxu1 %v398_v18  ;;  %v392_v30 = vld [vmem:[#allocation6 + $0x88] sm:$0xff]  ;;  %v424_v31 = vld [vmem:[#allocation7 + $0x80] sm:$0xff]  ;;  %v423_v33 = vld [vmem:[#allocation7 + $0x78] sm:$0xff] }
  0x85   : > { %449 = vmatpush1.msra.mxu0 %v430_v19  ;;  %520 = vmatpush1.msra.mxu1 %v397_v20  ;;  %v391_v32 = vld [vmem:[#allocation6 + $0x80] sm:$0xff]  ;;  %v390_v34 = vld [vmem:[#allocation6 + $0x78] sm:$0xff]  ;;  %v422_v35 = vld [vmem:[#allocation7 + $0x70] sm:$0xff] }
  0x86   : > { %450 = vmatprep.subr.mxu0 %v429_v21  ;;  %521 = vmatprep.subr.mxu1 %v396_v22  ;;  %v389_v36 = vld [vmem:[#allocation6 + $0x70] sm:$0xff]  ;;  %v421_v37 = vld [vmem:[#allocation7 + $0x68] sm:$0xff]  ;;  %v420_v39 = vld [vmem:[#allocation7 + $0x60] sm:$0xff] }
  0x87   : > { %451 = vmatpush1.msra.mxu0 %v428_v23  ;;  %522 = vmatpush1.msra.mxu1 %v395_v24  ;;  %v388_v38 = vld [vmem:[#allocation6 + $0x68] sm:$0xff]  ;;  %v387_v40 = vld [vmem:[#allocation6 + $0x60] sm:$0xff]  ;;  %v419_v41 = vld [vmem:[#allocation7 + $0x58] sm:$0xff] }
  0x88   : > { %452 = vmatprep.subr.mxu0 %v427_v25  ;;  %523 = vmatprep.subr.mxu1 %v394_v26  ;;  %v386_v42 = vld [vmem:[#allocation6 + $0x58] sm:$0xff]  ;;  %v418_v43 = vld [vmem:[#allocation7 + $0x50] sm:$0xff]  ;;  %v417_v45 = vld [vmem:[#allocation7 + $0x48] sm:$0xff] }
  0x89   : > { %453 = vmatpush1.msra.mxu0 %v426_v27  ;;  %524 = vmatpush1.msra.mxu1 %v393_v28  ;;  %v385_v44 = vld [vmem:[#allocation6 + $0x50] sm:$0xff]  ;;  %v384_v46 = vld [vmem:[#allocation6 + $0x48] sm:$0xff]  ;;  %v416_v47 = vld [vmem:[#allocation7 + $0x40] sm:$0xff] }
  0x8a   : > { %454 = vmatprep.subr.mxu0 %v425_v29  ;;  %525 = vmatprep.subr.mxu1 %v392_v30  ;;  %v383_v48 = vld [vmem:[#allocation6 + $0x40] sm:$0xff]  ;;  %v415_v49 = vld [vmem:[#allocation7 + $0x38] sm:$0xff]  ;;  %v414_v51 = vld [vmem:[#allocation7 + $0x30] sm:$0xff] }
  0x8b   : > { %455 = vmatpush1.msra.mxu0 %v424_v31  ;;  %526 = vmatpush1.msra.mxu1 %v391_v32  ;;  %v382_v50 = vld [vmem:[#allocation6 + $0x38] sm:$0xff]  ;;  %v381_v52 = vld [vmem:[#allocation6 + $0x30] sm:$0xff]  ;;  %v413_v53 = vld [vmem:[#allocation7 + $0x28] sm:$0xff] }
  0x8c   : > { %456 = vmatprep.subr.mxu0 %v423_v33  ;;  %527 = vmatprep.subr.mxu1 %v390_v34  ;;  %v380_v54 = vld [vmem:[#allocation6 + $0x28] sm:$0xff]  ;;  %v412_v55 = vld [vmem:[#allocation7 + $0x20] sm:$0xff]  ;;  %v411_v57 = vld [vmem:[#allocation7 + $0x18] sm:$0xff] }
  0x8d   : > { %457 = vmatpush1.msra.mxu0 %v422_v35  ;;  %528 = vmatpush1.msra.mxu1 %v389_v36  ;;  %v379_v56 = vld [vmem:[#allocation6 + $0x20] sm:$0xff]  ;;  %v378_v58 = vld [vmem:[#allocation6 + $0x18] sm:$0xff]  ;;  %v410_v59 = vld [vmem:[#allocation7 + $0x10] sm:$0xff]  ;;  %v584_v35 = vlaneseq }
  0x8e   : > { %458 = vmatprep.subr.mxu0 %v421_v37  ;;  %529 = vmatprep.subr.mxu1 %v388_v38  ;;  %v377_v60 = vld [vmem:[#allocation6 + $0x10] sm:$0xff]  ;;  %v409_v61 = vld [vmem:[#allocation7 + $0x8] sm:$0xff]  ;;  %v408_v63 = vld [vmem:[#allocation7] sm:$0xff] }
  0x8f   : > { %459 = vmatpush1.msra.mxu0 %v420_v39  ;;  %530 = vmatpush1.msra.mxu1 %v387_v40  ;;  %v376_v62 = vld [vmem:[#allocation6 + $0x8] sm:$0xff]  ;;  %v375_v0 = vld [vmem:[#allocation6] sm:$0xff]  ;;  %v407_v1 = vld [vmem:[%s323_s30] sm:$0xff]  ;;  %v585_v36 = vshrl.u32 %v584_v35, 7 }
  0x90   : > { %460 = vmatprep.subr.mxu0 %v419_v41  ;;  %531 = vmatprep.subr.mxu1 %v386_v42  ;;  %v374_v2 = vld [vmem:[%s314_s21] sm:$0xff]  ;;  %v629_v3 = vld [vmem:[#allocation9 + $0xf8] sm:$0xff]  ;;  %v628_v5 = vld [vmem:[#allocation9 + $0xf0] sm:$0xff] }
  0x91   : > { %461 = vmatpush1.msra.mxu0 %v418_v43  ;;  %532 = vmatpush1.msra.mxu1 %v385_v44  ;;  %v613_v4 = vld [vmem:[#allocation9 + $0x78] sm:$0xff]  ;;  %v612_v6 = vld [vmem:[#allocation9 + $0x70] sm:$0xff]  ;;  %v627_v7 = vld [vmem:[#allocation9 + $0xe8] sm:$0xff]  ;;  %v586_v37 = vsub.s32 0, %v585_v36  ;;  %v590_v39 = vsub.s32 1, %v585_v36 }
  0x92   : > { %462 = vmatprep.subr.mxu0 %v417_v45  ;;  %533 = vmatprep.subr.mxu1 %v384_v46  ;;  %v611_v8 = vld [vmem:[#allocation9 + $0x68] sm:$0xff]  ;;  %v626_v9 = vld [vmem:[#allocation9 + $0xe0] sm:$0xff]  ;;  %v625_v11 = vld [vmem:[#allocation9 + $0xd8] sm:$0xff] }
  0x93   : > { %463 = vmatpush1.msra.mxu0 %v416_v47  ;;  %534 = vmatpush1.msra.mxu1 %v383_v48  ;;  %v610_v10 = vld [vmem:[#allocation9 + $0x60] sm:$0xff]  ;;  %v609_v12 = vld [vmem:[#allocation9 + $0x58] sm:$0xff]  ;;  %v624_v13 = vld [vmem:[#allocation9 + $0xd0] sm:$0xff] }
  0x94   : > { %464 = vmatprep.subr.mxu0 %v415_v49  ;;  %535 = vmatprep.subr.mxu1 %v382_v50  ;;  %v608_v14 = vld [vmem:[#allocation9 + $0x50] sm:$0xff]  ;;  %v623_v15 = vld [vmem:[#allocation9 + $0xc8] sm:$0xff]  ;;  %v622_v17 = vld [vmem:[#allocation9 + $0xc0] sm:$0xff] }
  0x95   : > { %465 = vmatpush1.msra.mxu0 %v414_v51  ;;  %536 = vmatpush1.msra.mxu1 %v381_v52  ;;  %v607_v16 = vld [vmem:[#allocation9 + $0x48] sm:$0xff]  ;;  %v606_v18 = vld [vmem:[#allocation9 + $0x40] sm:$0xff]  ;;  %v621_v19 = vld [vmem:[#allocation9 + $0xb8] sm:$0xff] }
  0x96   : > { %466 = vmatprep.subr.mxu0 %v413_v53  ;;  %537 = vmatprep.subr.mxu1 %v380_v54  ;;  %v605_v20 = vld [vmem:[#allocation9 + $0x38] sm:$0xff]  ;;  %v620_v21 = vld [vmem:[#allocation9 + $0xb0] sm:$0xff]  ;;  %v619_v23 = vld [vmem:[#allocation9 + $0xa8] sm:$0xff] }
  0x97   : > { %467 = vmatpush1.msra.mxu0 %v412_v55  ;;  %538 = vmatpush1.msra.mxu1 %v379_v56  ;;  %v604_v22 = vld [vmem:[#allocation9 + $0x30] sm:$0xff]  ;;  %v603_v24 = vld [vmem:[#allocation9 + $0x28] sm:$0xff]  ;;  %v618_v25 = vld [vmem:[#allocation9 + $0xa0] sm:$0xff] }
  0x98   : > { %468 = vmatprep.subr.mxu0 %v411_v57  ;;  %539 = vmatprep.subr.mxu1 %v378_v58  ;;  %v602_v26 = vld [vmem:[#allocation9 + $0x20] sm:$0xff]  ;;  %v617_v27 = vld [vmem:[#allocation9 + $0x98] sm:$0xff]  ;;  %v616_v29 = vld [vmem:[#allocation9 + $0x90] sm:$0xff] }
  0x99   : > { %469 = vmatpush1.msra.mxu0 %v410_v59  ;;  %540 = vmatpush1.msra.mxu1 %v377_v60  ;;  %v601_v28 = vld [vmem:[#allocation9 + $0x18] sm:$0xff]  ;;  %v600_v30 = vld [vmem:[#allocation9 + $0x10] sm:$0xff]  ;;  %v615_v31 = vld [vmem:[#allocation9 + $0x88] sm:$0xff] }
  0x9a   : > { %470 = vmatprep.subr.mxu0 %v409_v61  ;;  %541 = vmatprep.subr.mxu1 %v376_v62  ;;  %v599_v32 = vld [vmem:[#allocation9 + $0x8] sm:$0xff]  ;;  %v614_v33 = vld [vmem:[#allocation9 + $0x80] sm:$0xff] }
  0x9b   : > { %471 = vmatpush1.msra.mxu0 %v408_v63  ;;  %542 = vmatpush1.msra.mxu1 %v375_v0  ;;  %v598_v34 = vld [vmem:[#allocation9] sm:$0xff] }
  0x9c   : > { %505 = vmatmul.mubr.f32.vlgmr.msra.gmra.mxu0 %v407_v1  ;;  %576 = vmatmul.mubr.f32.vlgmr.msra.gmra.mxu1 %v374_v2  ;;  %v582_v38 = vld [vmem:[%s1396_s4] sm:$0x3] }
  0x9d   : > { %844 = vmatprep.subr.mxu0 %v629_v3  ;;  %v587_v42 = vrot.slane %v582_v38, %v586_v37  ;;  %v591_v44 = vrot.slane %v582_v38, %v590_v39  ;;  %v841_v53 = vld [vmem:[%s1398_s6] ss:$0 sm:$0xff] }
  0x9e   : > { %845 = vmatpush3.msra.mxu0 %v613_v4 }
  0x9f   : > { %846 = vmatprep.subr.mxu0 %v628_v5 }
  0xa0   : > { %847 = vmatpush3.msra.mxu0 %v612_v6 }
  0xa1   : > { %848 = vmatprep.subr.mxu0 %v627_v7 }
  0xa2   : > { %849 = vmatpush3.msra.mxu0 %v611_v8 }
  0xa3   : > { %850 = vmatprep.subr.mxu0 %v626_v9 }
  0xa4   : > { %851 = vmatpush3.msra.mxu0 %v610_v10 }
  0xa5   : > { %852 = vmatprep.subr.mxu0 %v625_v11 }
  0xa6   : > { %853 = vmatpush3.msra.mxu0 %v609_v12 }
  0xa7   : > { %854 = vmatprep.subr.mxu0 %v624_v13 }
  0xa8   : > { %855 = vmatpush3.msra.mxu0 %v608_v14 }
  0xa9   : > { %856 = vmatprep.subr.mxu0 %v623_v15 }
  0xaa   : > { %857 = vmatpush3.msra.mxu0 %v607_v16 }
  0xab   : > { %858 = vmatprep.subr.mxu0 %v622_v17 }
  0xac   : > { %859 = vmatpush3.msra.mxu0 %v606_v18 }
  0xad   : > { %860 = vmatprep.subr.mxu0 %v621_v19 }
  0xae   : > { %861 = vmatpush3.msra.mxu0 %v605_v20 }
  0xaf   : > { %862 = vmatprep.subr.mxu0 %v620_v21 }
  0xb0   : > { %863 = vmatpush3.msra.mxu0 %v604_v22 }
  0xb1   : > { %864 = vmatprep.subr.mxu0 %v619_v23 }
  0xb2   : > { %865 = vmatpush3.msra.mxu0 %v603_v24 }
  0xb3   : > { %866 = vmatprep.subr.mxu0 %v618_v25 }
  0xb4   : > { %867 = vmatpush3.msra.mxu0 %v602_v26 }
  0xb5   : > { %868 = vmatprep.subr.mxu0 %v617_v27 }
  0xb6   : > { %869 = vmatpush3.msra.mxu0 %v601_v28 }
  0xb7   : > { %870 = vmatprep.subr.mxu0 %v616_v29 }
  0xb8   : > { %871 = vmatpush3.msra.mxu0 %v600_v30 }
  0xb9   : > { %872 = vmatprep.subr.mxu0 %v615_v31 }
  0xba   : > { %873 = vmatpush3.msra.mxu0 %v599_v32 }
  0xbb   : > { %874 = vmatprep.subr.mxu0 %v614_v33 }
  0xbc   : > { %875 = vmatpush3.msra.mxu0 %v598_v34 }
 0x15c   : > { %v506_v40 = vpop.f32.mrf.mxu0  ;;  %v577_v41 = vpop.f32.mrf.mxu1 }
 0x15d   : > { %v578_v43 = vadd.f32 %v577_v41, %v506_v40 }
 0x15e   : > { %v508_v45 = vpop.f32.mrf.mxu0  ;;  %v579_v46 = vpop.f32.mrf.mxu1 }
 0x15f   : > { %v580_v47 = vadd.f32 %v579_v46, %v508_v45  ;;  %v594_v48 = vadd.f32 %v587_v42, %v578_v43 }
 0x161   : > { %v595_v49 = vadd.f32 %v591_v44, %v580_v47  ;;  %v596_v51 = vmax.f32 %v594_v48, 0.0 }
 0x163   : > { %v597_v50 = vmax.f32 %v595_v49, 0.0 }
 0x165   : > { %701 = vmatprep.mubr.f32.mxu0 %v597_v50 }
 0x166   : > { %702 = vmatmul.mubr.f32.vlgmr.msra.gmra.mxu0 %v596_v51 }
 0x226   : > { %v876_v52 = vpop.f32.mrf.mxu0 }
 0x228   : > { %v877_v54 = vpop.f32.mrf.mxu0 }
 0x229   : > { %v878_v55 = vadd.f32 %v877_v54, %v876_v52 }
 0x22b   : > { %v704_v56 = vadd.f32 %v878_v55, %v841_v53 }
 0x22d   : > { %707 = vst [vmem:[%s373_s19] sm:$0xff] %v704_v56 }
 0x22e PF: > { %p21_p10 = scmp.ge.s32.totalorder %s1261_s12, 4   ;;  %s1415_s24 = smov %s1131_s25 }
 0x22f   : > { %s1416_s25 = smov %s1135_s26  ;;  %s1417_s26 = smov %s1271_s16 }
 0x230   : > { %s1418_s27 = smov %s1261_s12  ;;  %23 = sbr.rel (!%p21_p10) target bundleno = 8 (0x8), region = 113 }
 0x235   :  { %727 = vsyncpa [#allocation3], 1 }
 0x236   :  { %729 = vsyncpa [#allocation3 + $0x1], 1 }
 0x237   :  { %730 = vsyncpa [#allocation5], 1 }
 0x238   :  { %732 = vsyncpa [#allocation5 + $0x1], 1 }
 0x239   :  { %733 = vsyncpa [#allocation8], 1 }

</bundles_post_ra>
